<compile_context>
chip_gen: v7x
topology: tpu7x:2x2x1
jax: 0.10.0
libtpu: 0.0.40
codegen_flags: <defaults>
</compile_context>

<pallas_src>
import jax
import jax.numpy as jnp
from jax.experimental import pallas as pl
from jax.experimental.pallas import tpu as pltpu


def _noise_injection_kernel(img_ref, nz_ref, w_ref, o_ref):
    # img_ref : (1, cb, lb)      image tile
    # nz_ref  : (1, cb|1, lb)    noise tile (size-1 channel block when the
    #                            noise is broadcast over channels)
    # w_ref   : (cb, 1)          per-channel scale
    # o_ref   : (1, cb, lb)
    dt = o_ref.dtype
    img = img_ref[...].astype(dt)
    nz = nz_ref[...].astype(dt)
    w = w_ref[...].astype(dt)[None, :, :]          # (1, cb, 1)
    # w broadcasts over lanes, nz broadcasts over channels when Cn == 1 — all
    # in vregs, no extra HBM traffic.
    o_ref[...] = img + w * nz


def _sublane_rows(*dtypes):
    """Sublane tile for the most tightly packed dtype: 8 f32, 16 bf16, 32 i8."""
    itemsize = min(jnp.dtype(d).itemsize for d in dtypes)
    return max(8, 32 // itemsize)


def _pick_blocks(C, L, itemsize, sublane, target_bytes):
    """Pick (cb, lb) so a (1, cb, lb) block is ~target_bytes and lane-dense."""
    row_bytes = L * itemsize
    if row_bytes >= target_bytes:
        # Very wide rows: few channels per step, tile lanes in multiples of 128.
        lb = max(128, (target_bytes // itemsize) // 128 * 128)
        lb = min(lb, L)
        return min(C, sublane), lb
    cb = target_bytes // row_bytes
    if cb >= C:
        return C, L
    cb = (cb // sublane) * sublane
    if cb == 0:
        cb = min(C, sublane)
    return cb, L


def _ensure_multicore(N, C, L, cb, lb, sublane):
    """v7x has 2 TensorCores: guarantee >= 2 blocks on a parallel grid axis.

    No effect on v5e/v6e (single TC) or on grids that are already split.
    """
    n_blocks = N * (-(-C // cb)) * (-(-L // lb))
    if n_blocks >= 2:
        return cb, lb
    if L >= 256:
        lb = (((L + 1) // 2) + 127) // 128 * 128     # 2 lane blocks, 128-aligned
    elif C >= 2 * sublane:
        cb = (((C + 1) // 2) + sublane - 1) // sublane * sublane
    # else: tensor is tiny; a single block is fine.
    return cb, lb


def noise_injection(image: jax.Array, noise: jax.Array, weight: jax.Array,
                    *, target_bytes: int = 4 << 20) -> jax.Array:
    """out = image + weight * noise  (NoiseInjection.forward)."""
    N, C, H, W = image.shape
    Nn, Cn, Hn, Wn = noise.shape
    assert weight.shape == (1, C, 1, 1), weight.shape
    assert Nn in (1, N) and Cn in (1, C) and (Hn, Wn) == (H, W), noise.shape

    L = H * W
    # PyTorch type promotion: output dtype is the promoted dtype; the kernel
    # computes directly in it (bf16 stays bf16, mixed bf16/f32 computes in f32).
    out_dtype = jnp.result_type(image.dtype, noise.dtype, weight.dtype)

    # Free, lane-dense flat views.  Noise is NOT broadcast or cast here.
    img3 = image.reshape(N, C, L)
    nz3 = noise.reshape(Nn, Cn, L)
    wcol = weight.reshape(C, 1)

    itemsize = max(jnp.dtype(d).itemsize
                   for d in (image.dtype, noise.dtype, out_dtype))
    sublane = _sublane_rows(image.dtype, noise.dtype, out_dtype)
    cb, lb = _pick_blocks(C, L, itemsize, sublane, target_bytes)
    cb, lb = _ensure_multicore(N, C, L, cb, lb, sublane)

    # Lane axis (l) is the innermost grid axis: the (cb, 1) weight block index
    # is constant across consecutive steps, so Pallas does not re-DMA it.
    grid = (N, pl.cdiv(C, cb), pl.cdiv(L, lb))

    nz_cb = cb if Cn == C else 1

    def nz_map(n, c, l):
        return (n if Nn == N else 0, c if Cn == C else 0, l)

    # TODO(synk): for H*W < 128 (4x4/8x8 StyleGAN levels) the lane block is
    # narrower than 128 (masked stores); folding W into lanes would need a
    # per-lane weight layout — left as-is since absolute time there is tiny.
    out3 = pl.pallas_call(
        _noise_injection_kernel,
        out_shape=jax.ShapeDtypeStruct((N, C, L), out_dtype),
        grid_spec=pltpu.PrefetchScalarGridSpec(
            num_scalar_prefetch=0,
            grid=grid,
            in_specs=[
                pl.BlockSpec((1, cb, lb), lambda n, c, l: (n, c, l)),   # image
                pl.BlockSpec((1, nz_cb, lb), nz_map),                   # noise
                pl.BlockSpec((cb, 1), lambda n, c, l: (c, 0)),          # weight
            ],
            out_specs=pl.BlockSpec((1, cb, lb), lambda n, c, l: (n, c, l)),
        ),
        compiler_params=pltpu.CompilerParams(
            dimension_semantics=("parallel", "parallel", "parallel"),
            # double-buffered: 2 x 3 arrays x ~4 MiB blocks ~= 24 MiB;
            # 32 MiB <= physical VMEM on every generation (v7x: 64 MiB/TC).
            vmem_limit_bytes=32 << 20,
        ),
    )(img3, nz3, wcol)
    return out3.reshape(N, C, H, W)


if __name__ == "__main__":
    key = jax.random.PRNGKey(0)
    k_img, k_noise, k_w = jax.random.split(key, 3)

    N, C, H, W = 2, 4, 16, 16
    image = jax.random.normal(k_img, (N, C, H, W), dtype=jnp.float32)
    noise = jax.random.normal(k_noise, (N, C, H, W), dtype=jnp.float32)
    # The module initializes weight to zeros; use a random value so the test
    # exercises the multiply-add path (a trained weight is nonzero).
    weight = jax.random.normal(k_w, (1, C, 1, 1), dtype=jnp.float32)

    # Full-shape noise.
    out = jax.block_until_ready(noise_injection(image, noise, weight))
    ref = image + weight * noise
    assert out.shape == (N, C, H, W) and out.dtype == ref.dtype
    assert jnp.allclose(out, ref, atol=1e-6, rtol=1e-6)

    # StyleGAN-typical (N, 1, H, W) noise — broadcast over channels happens
    # inside the kernel, no materialized copy.
    noise_b = jax.random.normal(k_noise, (N, 1, H, W), dtype=jnp.float32)
    out_b = jax.block_until_ready(noise_injection(image, noise_b, weight))
    ref_b = image + weight * noise_b
    assert jnp.allclose(out_b, ref_b, atol=1e-6, rtol=1e-6)

    # Zero-init weight (the module's initial state): forward must be identity.
    out0 = jax.block_until_ready(
        noise_injection(image, noise, jnp.zeros((1, C, 1, 1), jnp.float32)))
    assert jnp.allclose(out0, image, atol=1e-6, rtol=1e-6)

    print("KERNEL_OK")
</pallas_src>

<mosaic_0001>
module attributes {stable_mosaic.version = 11 : i64} {
  func.func @_noise_injection_kernel(%arg0: i32, %arg1: i32, %arg2: i32, %arg3: memref<1x4x256xf32, #tpu.memory_space<vmem>>, %arg4: memref<1x4x256xf32, #tpu.memory_space<vmem>>, %arg5: memref<4x1xf32, #tpu.memory_space<vmem>>, %arg6: memref<1x4x256xf32, #tpu.memory_space<vmem>>) attributes {dimension_semantics = [#tpu.dimension_semantics<parallel>, #tpu.dimension_semantics<parallel>, #tpu.dimension_semantics<parallel>], iteration_bounds = array<i64: 2, 1, 1>, scalar_prefetch = 0 : i64, scratch_operands = 0 : i64, tpu.core_type = #tpu.core_type<tc>, window_params = [{transform_indices = @transform_0, window_bounds = array<i64: 1, 4, 256>}, {transform_indices = @transform_1, window_bounds = array<i64: 1, 4, 256>}, {transform_indices = @transform_2, window_bounds = array<i64: 4, 1>}, {transform_indices = @transform_3, window_bounds = array<i64: 1, 4, 256>}]} {
    %c0 = arith.constant 0 : index
    %c0_0 = arith.constant 0 : index
    %c0_1 = arith.constant 0 : index
    %0 = vector.load %arg3[%c0, %c0_0, %c0_1] : memref<1x4x256xf32, #tpu.memory_space<vmem>>, vector<1x4x256xf32>
    %c0_2 = arith.constant 0 : index
    %c0_3 = arith.constant 0 : index
    %c0_4 = arith.constant 0 : index
    %1 = vector.load %arg4[%c0_2, %c0_3, %c0_4] : memref<1x4x256xf32, #tpu.memory_space<vmem>>, vector<1x4x256xf32>
    %c0_5 = arith.constant 0 : index
    %c0_6 = arith.constant 0 : index
    %2 = vector.load %arg5[%c0_5, %c0_6] : memref<4x1xf32, #tpu.memory_space<vmem>>, vector<4x1xf32>
    %3 = vector.shape_cast %2 : vector<4x1xf32> to vector<1x4x1xf32>
    %4 = vector.broadcast %3 : vector<1x4x1xf32> to vector<1x4x256xf32>
    %5 = arith.mulf %4, %1 : vector<1x4x256xf32>
    %6 = arith.addf %0, %5 : vector<1x4x256xf32>
    %c0_7 = arith.constant 0 : index
    %c0_8 = arith.constant 0 : index
    %c0_9 = arith.constant 0 : index
    %7 = vector.load %arg6[%c0_7, %c0_8, %c0_9] : memref<1x4x256xf32, #tpu.memory_space<vmem>>, vector<1x4x256xf32>
    tpu.vector_store %arg6[%c0_7, %c0_8, %c0_9], %6 {strides = array<i32>} : memref<1x4x256xf32, #tpu.memory_space<vmem>>, vector<1x4x256xf32>,
    return
  }
  func.func @transform_0(%arg0: i32, %arg1: i32, %arg2: i32) -> (i32, i32, i32) {
    %c0_i32 = arith.constant 0 : i32
    return %arg0, %arg1, %arg2 : i32, i32, i32
  }
  func.func @transform_1(%arg0: i32, %arg1: i32, %arg2: i32) -> (i32, i32, i32) {
    %c0_i32 = arith.constant 0 : i32
    return %arg0, %arg1, %arg2 : i32, i32, i32
  }
  func.func @transform_2(%arg0: i32, %arg1: i32, %arg2: i32) -> (i32, i32) {
    %c0_i32 = arith.constant 0 : i32
    %c0_i32_0 = arith.constant 0 : i32
    return %arg1, %c0_i32 : i32, i32
  }
  func.func @transform_3(%arg0: i32, %arg1: i32, %arg2: i32) -> (i32, i32, i32) {
    %c0_i32 = arith.constant 0 : i32
    return %arg0, %arg1, %arg2 : i32, i32, i32
  }
}

</mosaic_0001>

<bundles_post_ra>
// kernel: tpu_custom_call.1
= control target key start
LH: loop header
LB: loop body
LE: loop exit
PB: predicated region body
PF: predicated region fallthrough
CT: control target
= control target key end

     0   :  { %8 = vsyncpa [#allocation3], 0  ;;  %s944_s0 = inlined_call_operand.hbm [shape: f32[2,4,256], index: 0, kind: input, shape index: {}]   ;;  %s945_s1 = inlined_call_operand.hbm [shape: f32[2,4,256], index: 1, kind: input, shape index: {}]   ;;  %s946_s2 = inlined_call_operand.vmem [shape: f32[4,1], index: 2, kind: input, shape index: {}]   ;;  %s947_s3 = inlined_call_operand.hbm [shape: f32[2,4,256], index: 3, kind: output, shape index: {}]  }
   0x1   :  { %10 = vsyncpa [#allocation3 + $0x1], 0 }
   0x2   :  { %11 = vsyncpa [#allocation6], 0 }
   0x3   :  { %13 = vsyncpa [#allocation6 + $0x1], 0 }
   0x4   :  { %14 = vsyncpa [#allocation4], 0 }
   0x5   :  { %16 = vsyncpa [#allocation4 + $0x1], 0  ;;  %s721_s12 = smov 0   ;;  %s723_s13 = smov 0  }
   0x6   :  { %s725_s14 = smov 0   ;;  %s727_s15 = smov 0  }
   0x7   :  { %s729_s16 = smov 0   ;;  %s731_s17 = smov 0  }
   0x8 LB: > { %s456_s18 = sadd.s32 4294967295, %s695_s17   ;;  %s457_s19 = sadd.s32 4294967294, %s695_s17   ;;  %s695_s17 = sphi %s731_s17, %s22_s17   ;;  %s691_s16 = sphi %s729_s16, %s967_s16   ;;  %s687_s15 = sphi %s727_s15, %s966_s15   ;;  %s683_s14 = sphi %s725_s14, %s965_s14   ;;  %s679_s13 = sphi %s723_s13, %s964_s13   ;;  %s675_s12 = sphi %s721_s12, %s963_s12  }
   0x9   : > { %s41_s20 = sadd.s32 1, %s691_s16  ;;  %s52_s21 = sadd.s32 1, %s683_s14 }
   0xa   : > { %p43_p0 = scmp.ge.s32.totalorder %s41_s20, 2  ;;  %p59_p1 = scmp.ne.s32.totalorder %s683_s14, %s679_s13 }
   0xb   : > { %p60_p2 = scmp.eq.s32.totalorder %s695_s17, 0  ;;  %p65_p3 = scmp.ne.s32.totalorder %s679_s13, %s675_s12 }
   0xc   : > { %s969_s20 = smov (%p43_p0, %s41_s20), 0  ;;  %p66_p5 = scmp.eq.s32.totalorder %s456_s18, 0 }
   0xd   : > { %p762_p4 = por %p60_p2, %p59_p1  ;;  %s45_s23 = ssub.s32 %s691_s16, %s969_s20 }
   0xe   : > { %p149_p6 = scmp.eq.s32.totalorder %s456_s18, 1  ;;  %p50_p7 = scmp.eq.s32.totalorder %s45_s23, 0 }
   0xf   : > { %p768_p8 = por %p66_p5, %p65_p3  ;;  %p155_p10 = scmp.eq.s32.totalorder %s457_s19, 1 }
  0x10   : > { %p772_p9 = por %p149_p6, %p59_p1  ;;  %p496_p13 = scmp.lt.s32.totalorder %s695_s17, 2 }
  0x11   : > { %s951_s24 = scalar_select %p768_p8, 1, 0 }
  0x12   : > { %s952_s25 = scalar_select %p772_p9, 1, 0 }
  0x13   : > { %s777_s26 = scalar_select %p50_p7, %s683_s14, %s52_s21  }
  0x14   : > { %p779_p11 = por %p155_p10, %p65_p3  ;;  %s786_s28 = sand.u32 1, %s683_s14  }
  0x15   : > { %s461_s29 = sshll.u32 %s786_s28, 3  ;;  %s476_s30 = sshll.u32 %s691_s16, 7 }
  0x16   : > { %s953_s27 = scalar_select %p779_p11, 1, 0 }
  0x17   : > { %s795_s6 = scalar_lea.hbm %s944_s0, %s476_s30  ;;  %s186_s7 = scalar_lea.vmem [#allocation2], %s461_s29 }
  0x18   : > { %s198_s8 = sshll.u32 %s186_s7, 4  ;;  %p803_p0 = pnand %p496_p13, %p762_p4  ;;  %s799_s8 = int_to_ptr.vmem [resolvable:$true] %s198_s8 }
  0x19   : > { %s183_s10 = scalar_lea.sflag [#allocation3], %s786_s28  ;;  %s549_s11 = scalar_lea.hbm %s795_s6, 128 }
  0x1a   : > { %p550_p3 = scmp.ne.s32.totalorder %s795_s6, %s549_s11  ;;  %p551_p5 = pneg %p803_p0 }
  0x1b   : > { %s554_s21 = scalar_lea.hbm %s944_s0, 256  ;;  %p555_p4 = scmp.lt.u32.totalorder %s795_s6, %s944_s0 }
  0x1c   : > { %p552_p6 = pnand %p551_p5, %p550_p3  ;;  %p556_p10 = scmp.lt.u32.totalorder %s554_s21, %s549_s11 }
  0x1d   : > { %p558_p12 = scmp.lt.u32.totalorder %s549_s11, %s795_s6 }
  0x1e   : > { %p553_p7 = pneg %p552_p6  ;;  %p557_p13 = por %p556_p10, %p555_p4 }
  0x20   : > { %p559_p1 = por %p558_p12, %p557_p13 }
  0x22   : > { %p560_p2 = pnand %p559_p1, %p553_p7 }
  0x24   : > { %563 = shalt.err (!%p560_p2)
}
  0x25   : > { %s564_s4 = scalar_lea.vmem %s799_s8, 128  ;;  %s697_s5 = smov [#allocation2]  }
  0x26   : > { %p565_p3 = scmp.ne.s32.totalorder %s799_s8, %s564_s4  ;;  %s569_s7 = sshll.u32 %s697_s5, 4  ;;  %s570_s7 = int_to_ptr.vmem [resolvable:$false] %s569_s7 }
  0x27   : > { %s571_s18 = scalar_lea.vmem %s570_s7, 256  ;;  %p572_p9 = scmp.lt.s32.totalorder %s799_s8, %s570_s7 }
  0x28   : > { %p567_p6 = pnand %p565_p3, %p551_p5  ;;  %p573_p4 = scmp.lt.s32.totalorder %s571_s18, %s564_s4 }
  0x2a   : > { %p568_p11 = pneg %p567_p6  ;;  %p574_p10 = por %p573_p4, %p572_p9 }
  0x2c   : > { %p575_p12 = pnand %p574_p10, %p568_p11 }
  0x2e   : > { %578 = shalt.err (!%p575_p12)
}
  0x2f   : > { %488 = dma.hbm_to_vmem [thread:$0]  (!%p803_p0), %s795_s6, 128, %s799_s8, %s183_s10  }
  0x30   : > { %p955_p1 = scmp.lt.s32.totalorder %s695_s17, 3  ;;  %p956_p2 = scmp.ge.s32.totalorder %s695_s17, 1 }
  0x31   : > { %s848_s22 = scalar_lea.hbm %s945_s1, %s476_s30  ;;  %s209_s23 = scalar_lea.vmem [#allocation5], %s461_s29 }
  0x32   : > { %p839_p7 = pnand %p956_p2, %p955_p1  ;;  %s221_s4 = sshll.u32 %s209_s23, 4  ;;  %s222_s4 = int_to_ptr.vmem [resolvable:$true] %s221_s4 }
  0x33   : > { %s206_s6 = scalar_lea.sflag [#allocation6], %s786_s28  ;;  %s579_s8 = scalar_lea.hbm %s848_s22, 128 }
  0x34   : > { %s957_s11 = scalar_select %p839_p7, 1, 0 }
  0x35   : > { %p580_p9 = scmp.ne.s32.totalorder %s848_s22, %s579_s8  ;;  %s584_s30 = scalar_lea.hbm %s945_s1, 256 }
  0x36   : > { %p585_p3 = scmp.lt.u32.totalorder %s848_s22, %s945_s1  ;;  %p586_p6 = scmp.lt.u32.totalorder %s584_s30, %s579_s8 }
  0x37   : > { %p582_p11 = pnand %p580_p9, %p551_p5  ;;  %p588_p10 = scmp.lt.u32.totalorder %s579_s8, %s848_s22 }
  0x38   : > { %p587_p4 = por %p586_p6, %p585_p3 }
  0x39   : > { %p583_p13 = pneg %p582_p11 }
  0x3a   : > { %p589_p12 = por %p588_p10, %p587_p4 }
  0x3c   : > { %p590_p1 = pnand %p589_p12, %p583_p13 }
  0x3e   : > { %593 = shalt.err (!%p590_p1)
}
  0x3f   : > { %s594_s28 = scalar_lea.vmem %s222_s4, 128  ;;  %s698_s29 = smov [#allocation5]  }
  0x40   : > { %p595_p2 = scmp.ne.s32.totalorder %s222_s4, %s594_s28  ;;  %s599_s19 = sshll.u32 %s698_s29, 4  ;;  %s600_s19 = int_to_ptr.vmem [resolvable:$false] %s599_s19 }
  0x41   : > { %s601_s21 = scalar_lea.vmem %s600_s19, 256  ;;  %p602_p8 = scmp.lt.s32.totalorder %s222_s4, %s600_s19 }
  0x42   : > { %p597_p9 = pnand %p595_p2, %p551_p5  ;;  %p603_p7 = scmp.lt.s32.totalorder %s601_s21, %s594_s28 }
  0x44   : > { %p598_p11 = pneg %p597_p9  ;;  %p604_p3 = por %p603_p7, %p602_p8 }
  0x46   : > { %p605_p6 = pnand %p604_p3, %p598_p11 }
  0x48   : > { %608 = shalt.err (!%p605_p6)
}
  0x49   : > { %491 = dma.hbm_to_vmem [thread:$0]  (!%p803_p0), %s848_s22, 128, %s222_s4, %s206_s6  }
  0x4a   : > { %p958_p13 = scmp.ne.s32.totalorder %s957_s11, 0 }
  0x4b   : > { %s875_s23 = sand.u32 (!%p958_p13), 1, %s679_s13   ;;  %p959_p5 = scmp.ne.s32.totalorder (!%p958_p13), %s951_s24, 0 }
  0x4c   : > { %230 = sbr.rel (%p958_p13) target bundleno = 236 (0xec), region = 32  ;;  %s468_s8 = sshll.u32 (!%p958_p13), %s875_s23, 3 }
  0x4d   : > { %s233_s10 = scalar_lea.sflag (!%p958_p13), [#allocation3], %s875_s23  ;;  %s236_s5 = scalar_lea.vmem (!%p958_p13), [#allocation2], %s468_s8 }
  0x53   : > { %662 = dma.done.wait (%p959_p5), %s233_s10, 128  }
  0x54   : > { %664 = vsyncadd (%p959_p5), %s233_s10, 4294967168  ;;  %s242_s9 = scalar_lea.sflag [#allocation6], %s875_s23  ;;  %s245_s22 = scalar_lea.vmem [#allocation5], %s468_s8 }
  0x55   : > { %666 = dma.done.wait (%p959_p5), %s242_s9, 128  }
  0x56   : > { %668 = vsyncadd (%p959_p5), %s242_s9, 4294967168  ;;  %v699_v0 = vmov 0   ;;  %v286_v1 = vld [vmem:[%s946_s2] sm:$0xf]  ;;  %v285_v2 = vld [vmem:[%s245_s22] sm:$0xff]  ;;  %s478_s6 = sshll.u32 %s687_s15, 7 }
  0x57   : > { %547 = vset.pattern.permute.xlu0 %v699_v0  ;;  %v293_v3 = vcombine.high %v285_v2, %v285_v2  ;;  %v284_v7 = vld [vmem:[%s236_s5] sm:$0xff]  ;;  %s276_s30 = scalar_lea.vmem [#allocation7], %s468_s8  ;;  %s895_s28 = scalar_lea.hbm %s947_s3, %s478_s6 }
  0x58   : > { %289 = vperm.xlu0 %547, %v286_v1   ;;  %s322_s24 = sshll.u32 %s276_s30, 4  ;;  %s304_s29 = scalar_lea.sflag [#allocation4], %s875_s23  ;;  %s897_s24 = int_to_ptr.vmem [resolvable:$true] %s322_s24 }
  0x59   : > { %s609_s19 = scalar_lea.vmem %s897_s24, 128  ;;  %p960_p0 = scmp.ne.s32.totalorder %s952_s25, 0 }
  0x5a   : > { %p610_p8 = scmp.ne.s32.totalorder %s897_s24, %s609_s19  ;;  %s700_s15 = smov [#allocation7]  }
  0x5b   : > { %s613_s21 = sshll.u32 %s700_s15, 4  ;;  %s614_s21 = int_to_ptr.vmem [resolvable:$false] %s613_s21 }
  0x5c   : > { %p611_p7 = pnand %p610_p8, %p960_p0  ;;  %s615_s8 = scalar_lea.vmem %s614_s21, 256 }
  0x5d   : > { %p616_p10 = scmp.lt.s32.totalorder %s897_s24, %s614_s21  ;;  %p617_p12 = scmp.lt.s32.totalorder %s615_s8, %s609_s19 }
  0x5e   : > { %p612_p4 = pneg %p611_p7 }
  0x5f   : > { %p618_p1 = por %p617_p12, %p616_p10 }
  0x61   : > { %p619_p2 = pnand %p618_p1, %p612_p4 }
  0xd7   : > { %v290_v4 = vpop.permute.xlu0 %289 }
  0xd8   : > { %v295_v5 = vmul.f32 %v290_v4, %v285_v2  ;;  %v296_v6 = vmul.f32 %v293_v3, %v290_v4 }
  0xda   : > { %v299_v8 = vcombine.low %v295_v5, %v296_v6 }
  0xdc   : > { %v301_v9 = vadd.f32 %v299_v8, %v284_v7 }
  0xde   : > { %302 = vst [vmem:[%s276_s30] sm:$0xff] %v301_v9 }
  0xdf   : > { %622 = shalt.err (!%p619_p2)
}
  0xe0   : > { %s623_s23 = scalar_lea.hbm %s895_s28, 128  ;;  %s627_s9 = scalar_lea.hbm %s947_s3, 256 }
  0xe1   : > { %p624_p9 = scmp.ne.s32.totalorder %s895_s28, %s623_s23  ;;  %p628_p6 = scmp.lt.u32.totalorder %s895_s28, %s947_s3 }
  0xe2   : > { %p629_p13 = scmp.lt.u32.totalorder %s627_s9, %s623_s23  ;;  %p631_p8 = scmp.lt.u32.totalorder %s623_s23, %s895_s28 }
  0xe3   : > { %p625_p11 = pnand %p624_p9, %p960_p0 }
  0xe4   : > { %p630_p5 = por %p629_p13, %p628_p6 }
  0xe5   : > { %p626_p3 = pneg %p625_p11 }
  0xe6   : > { %p632_p7 = por %p631_p8, %p630_p5 }
  0xe8   : > { %p633_p4 = pnand %p632_p7, %p626_p3 }
  0xea   : > { %636 = shalt.err (!%p633_p4)
}
  0xeb   : > { %483 = dma.vmem_to_hbm [thread:$0]  (%p960_p0), %s897_s24, 128, %s895_s28, %s304_s29  }
  0xec PF: > { %s334_s4 = sand.u32 1, %s675_s12   ;;  %p961_p10 = scmp.ne.s32.totalorder %s953_s27, 0 }
  0xed   : > { %p962_p12 = scmp.ge.s32.totalorder %s695_s17, 2  ;;  %s335_s6 = scalar_lea.sflag [#allocation4], %s334_s4 }
  0xef   : > { %p493_p1 = pnand %p962_p12, %p961_p10 }
  0xf1   : > { %670 = dma.done.wait (!%p493_p1), %s335_s6, 128  }
  0xf2   : > { %672 = vsyncadd (!%p493_p1), %s335_s6, 4294967168  ;;  %s22_s17 = sadd.s32 1, %s695_s17   ;;  %s963_s12 = smov %s679_s13 }
  0xf3   : > { %p19_p2 = scmp.ge.s32.totalorder %s22_s17, 4   ;;  %s964_s13 = smov %s683_s14 }
  0xf4   : > { %s965_s14 = smov %s777_s26  ;;  %s966_s15 = smov %s691_s16 }
  0xf5   : > { %s967_s16 = smov %s969_s20  ;;  %21 = sbr.rel (!%p19_p2) target bundleno = 8 (0x8), region = 93 }
  0xfc   :  { %340 = vsyncpa [#allocation3], 1 }
  0xfd   :  { %342 = vsyncpa [#allocation3 + $0x1], 1 }
  0xfe   :  { %343 = vsyncpa [#allocation6], 1 }
  0xff   :  { %345 = vsyncpa [#allocation6 + $0x1], 1 }
 0x100   :  { %346 = vsyncpa [#allocation4], 1 }
 0x101   :  { %348 = vsyncpa [#allocation4 + $0x1], 1 }

</bundles_post_ra>
